<compile_context>
chip_gen: v5e
topology: v5e:2x2
jax: 0.10.0
libtpu: 0.0.40
codegen_flags: <defaults>
</compile_context>

<pallas_src>
import functools

import jax
import jax.numpy as jnp
import numpy as np
from jax.experimental import pallas as pl
from jax.experimental.pallas import tpu as pltpu


def _round_up(x, m):
    return -(-x // m) * m


# ----------------------------- Pallas kernel --------------------------------
def single_cnn_kernel(x_ref, w_ref, bias_ref, wa_ref, zgb_ref, out_ref, *, kernel_size, pad):
    """One batch tile of SingleCNN (eval mode), all BatchNorms pre-folded.

    x_ref    : (Bt, C, L)     raw input tile, native NCL layout (L on the lane axis)
    w_ref    : (Cout, K*C)    im2col conv weights (bn_start scale folded in; zero rows
                              for non-local channels)
    bias_ref : (Cout, Lout)   conv bias + bn_start bias per output position (edge-exact)
    wa_ref   : (D, Cout)      dense weights, local half (bn_cnn1 + bn_dense folded)
    zgb_ref  : (1, D, Bt)     dense bias + global-feature half, per batch column
    out_ref  : (1, D, Bt)     sigmoid outputs, batch on the lane axis (lane-dense store)
    """
    Bt, C, L = x_ref.shape
    K = kernel_size
    Cout = w_ref.shape[0]
    Lout = bias_ref.shape[1]

    x = x_ref[...]                                                # (Bt, C, L)

    # Conv zero padding along the lane axis, built in registers (no VMEM scratch,
    # no wrapper-side HBM pad).
    if pad > 0:
        zpad = jnp.zeros((Bt, C, pad), x.dtype)
        xp = jnp.concatenate([zpad, x, zpad], axis=2)             # (Bt, C, L + 2*pad)
    else:
        xp = x

    # im2col: stack the K tap-shifted views along the channel (sublane) axis.  The
    # shifts are static lane-axis slices of a value; zeros from the pad give exact
    # edge behaviour so no masks are needed.
    xcol = jnp.concatenate([xp[:, :, k:k + Lout] for k in range(K)], axis=1)  # (Bt, K*C, Lout)

    # Single batched MXU matmul per tile (canonical bik,bkl->bil form), f32 accumulation.
    wb = jnp.broadcast_to(w_ref[...][None], (Bt,) + w_ref.shape)  # (Bt, Cout, K*C)
    conv = jax.lax.dot_general(wb, xcol, (((2,), (1,)), ((0,), (0,))),
                               preferred_element_type=jnp.float32)            # (Bt, Cout, Lout)

    # Conv bias + bn_start bias per output position, ReLU, then
    # MaxPool1d(kernel_size == full conv length) == global max over the length axis.
    y = jnp.maximum(conv + bias_ref[...][None].astype(jnp.float32), 0.0)
    pooled = jnp.max(y, axis=2)                                               # (Bt, Cout) f32

    # bn_cnn1 / bn_dense / dense1 folded into wa / zgb.  Result laid out (D, Bt) so the
    # batch sits on the lane axis of the output block.
    za = jax.lax.dot_general(wa_ref[...], pooled, (((1,), (1,)), ((), ())),
                             preferred_element_type=jnp.float32)              # (D, Bt)
    z = za + zgb_ref[0]                                                       # + global half + bias

    # Numerically-stable sigmoid via EUP tanh (no exp overflow for large |z|).
    out_ref[0] = (0.5 * (jnp.tanh(0.5 * z) + 1.0)).astype(out_ref.dtype)


# ------------------------------- wrapper -------------------------------------
def bn_fold(gamma, beta, mean, var, eps=1e-5):
    scale = gamma / jnp.sqrt(var + eps)
    return scale, beta - mean * scale


def _vmem_capacity_bytes():
    try:
        return int(pltpu.get_tpu_info().vmem_capacity_bytes)
    except Exception:
        return 64 * 1024 * 1024          # v7x-sized conservative default


def _pick_b_tile(B, C, L, K, Cout, Lout, itemsize, budget_bytes):
    """Batch tile sized from the real per-batch-element VMEM consumers (conservative)."""
    Lp = _round_up(max(L + 2, Lout), 128)      # lane extent of x-sized values
    Cp = _round_up(C, 8)
    KCp = _round_up(K * C, 8)
    KCl = _round_up(K * C, 128)
    Coutp = _round_up(Cout, 8)
    per_elem = itemsize * (
        2 * Cp * Lp                            # double-buffered x input block
        + Cp * Lp                              # padded copy
        + KCp * Lp                             # im2col stack
        + Coutp * KCl                          # broadcast conv weights
    ) + 4 * (
        2 * Coutp * Lp                         # f32 conv activation + relu'd copy
        + Coutp * 128                          # pooled / small temporaries
    )
    bt = max(1, int(budget_bytes // max(per_elem, 1)))
    bt = min(bt, B)
    if B >= 2:                                 # keep >= 2 grid steps so both v7x TCs get work
        bt = min(bt, -(-B // 2))
    if bt >= 8:                                # sublane-friendly tile
        bt -= bt % 8
    return max(bt, 1)


def single_cnn_forward(x, params, local_features, global_features,
                       cnn_padding=2, b_tile=None):
    x = jnp.asarray(x)
    B, C_total, L = x.shape
    lf = np.asarray(local_features, dtype=np.int32)
    use_global = global_features is not None and len(global_features) > 0
    gf = np.asarray(global_features, dtype=np.int32) if use_global else np.zeros((0,), np.int32)

    conv_w, conv_b = params["conv_w"], params["conv_b"]
    dense_w, dense_b = params["dense_w"], params["dense_b"]
    Cout, Cin, K = conv_w.shape
    D = dense_w.shape[0]
    pad = int(cnn_padding)
    Lout = L + 2 * pad - (K - 1)               # conv output length (== MaxPool window)

    # ---- fold every BatchNorm (eval mode) into the conv / dense parameters ----
    bn0s, bn0b = bn_fold(params["bn0_g"], params["bn0_b"], params["bn0_m"], params["bn0_v"])
    bn1s, bn1b = bn_fold(params["bn1_g"], params["bn1_b"], params["bn1_m"], params["bn1_v"])
    bn2s, bn2b = bn_fold(params["bn2_g"], params["bn2_b"], params["bn2_m"], params["bn2_v"])

    # Conv taps with bn_start's scale folded in, scattered onto the FULL channel axis
    # (zero rows for non-local channels): the kernel reads x as-is and never gathers.
    w_taps = jnp.zeros((K, C_total, Cout), jnp.float32)
    w_taps = w_taps.at[:, lf, :].set(jnp.transpose(conv_w, (2, 1, 0)) * bn0s[None, :, None])
    # (Cout, K*C_total), channel-minor within each tap -- matches the kernel's im2col order.
    # Cast to x.dtype so the MXU operands match (bf16 x halves the dominant DMA if desired).
    W2 = jnp.transpose(w_taps, (2, 0, 1)).reshape(Cout, K * C_total).astype(x.dtype)

    # Per-output-position conv bias: conv_b plus the bn_start bias pushed through the taps
    # that are in range at that position (edge-exact w.r.t. the conv zero padding).
    bb = jnp.einsum("ock,c->ko", conv_w, bn0b)                            # (K, Cout)
    tap_pos = jnp.arange(Lout)[:, None] + jnp.arange(K)[None, :] - pad    # (Lout, K)
    valid = ((tap_pos >= 0) & (tap_pos < L)).astype(jnp.float32)
    pos_bias = (conv_b[None, :] + valid @ bb).T.astype(jnp.float32)       # (Cout, Lout)

    # bn_cnn1 / bn_dense folded into the dense layer; the (tiny) global-feature half is
    # computed in plain XLA and enters the kernel as a per-batch bias column.
    cs = bn1s * bn2s[:Cout]
    cb = bn1b * bn2s[:Cout] + bn2b[:Cout]
    wa = dense_w[:, :Cout]
    WA = (wa * cs[None, :]).astype(jnp.float32)                           # (D, Cout)
    db = dense_b + wa @ cb
    zg = jnp.zeros((B, D), jnp.float32)
    if use_global:
        gs = bn2s[Cout:]
        gb = bn2b[Cout:]
        wg = dense_w[:, Cout:]
        xg = x[:, gf, 0].astype(jnp.float32)                              # (B, nG)
        zg = xg @ (wg * gs[None, :]).T
        db = db + wg @ gb
    zg_full = (zg + db[None, :]).astype(jnp.float32)                      # (B, D)

    # ---- batch tiling (generation-aware VMEM budget) ----
    cap = _vmem_capacity_bytes()
    if b_tile is None:
        b_tile = _pick_b_tile(B, C_total, L, K, Cout, Lout,
                              jnp.dtype(x.dtype).itemsize,
                              budget_bytes=int(0.4 * cap))
    b_tile = int(max(1, min(b_tile, B)))
    nb = pl.cdiv(B, b_tile)

    # Global-branch pre-activation + dense bias as (nb, D, b_tile) slabs, batch on lanes.
    zg_t = jnp.pad(zg_full.T, ((0, 0), (0, nb * b_tile - B)))             # (D, nb*b_tile)
    zgb = jnp.transpose(zg_t.reshape(D, nb, b_tile), (1, 0, 2))           # (nb, D, b_tile)

    const2 = lambda b: (0, 0)
    grid_spec = pltpu.PrefetchScalarGridSpec(
        num_scalar_prefetch=0,
        grid=(nb,),
        in_specs=[
            pl.BlockSpec((b_tile, C_total, L), lambda b: (b, 0, 0)),   # x (pipelined, native NCL)
            pl.BlockSpec((Cout, K * C_total), const2),                 # conv im2col weights (resident)
            pl.BlockSpec((Cout, Lout), const2),                        # per-position bias (resident)
            pl.BlockSpec((D, Cout), const2),                           # dense local half (resident)
            pl.BlockSpec((1, D, b_tile), lambda b: (b, 0, 0)),         # global half + bias
        ],
        out_specs=pl.BlockSpec((1, D, b_tile), lambda b: (b, 0, 0)),
    )

    out = pl.pallas_call(
        functools.partial(single_cnn_kernel, kernel_size=K, pad=pad),
        out_shape=jax.ShapeDtypeStruct((nb, D, b_tile), jnp.float32),
        grid_spec=grid_spec,
        compiler_params=pltpu.CompilerParams(
            dimension_semantics=("parallel",),                  # v7x: batch split across TCs
            vmem_limit_bytes=int(min(0.75 * cap, 100 * 1024 * 1024)),
        ),
    )(x, W2, pos_bias, WA, zgb)

    # (nb, D, b_tile) -> (B, D): drop the padded tail columns (ragged last tile is only
    # ever garbage in dropped positions; every op is batch-row local).
    return jnp.transpose(out, (0, 2, 1)).reshape(nb * b_tile, D)[:B]


# ------------------------- pure-JAX reference --------------------------------
def reference_forward(x, params, local_features, global_features, cnn_padding=2):
    xl = x[:, jnp.asarray(local_features), :]
    xg = x[:, jnp.asarray(global_features), 0]
    bn0s, bn0b = bn_fold(params["bn0_g"], params["bn0_b"], params["bn0_m"], params["bn0_v"])
    bn1s, bn1b = bn_fold(params["bn1_g"], params["bn1_b"], params["bn1_m"], params["bn1_v"])
    bn2s, bn2b = bn_fold(params["bn2_g"], params["bn2_b"], params["bn2_m"], params["bn2_v"])
    xbn = xl * bn0s[None, :, None] + bn0b[None, :, None]
    y = jax.lax.conv_general_dilated(
        xbn, params["conv_w"], window_strides=(1,),
        padding=[(cnn_padding, cnn_padding)],
        dimension_numbers=("NCH", "OIH", "NCH"))
    y = y + params["conv_b"][None, :, None]
    y = jnp.maximum(y, 0.0)
    y = jnp.max(y, axis=2)                               # MaxPool over the full conv length
    y = y * bn1s + bn1b
    feat = jnp.concatenate([y, xg], axis=1)
    feat = feat * bn2s + bn2b
    z = feat @ params["dense_w"].T + params["dense_b"]
    return jax.nn.sigmoid(z)


# --------------------------------- main ---------------------------------------
if __name__ == "__main__":
    # Small, SingleCNN-consistent config.
    B, L = 4, 16
    local_features = [0, 1, 2, 3]        # n_local = 4
    global_features = [4, 5, 6]          # n_global = 3
    Cin, nG = len(local_features), len(global_features)
    Cout, K, dense_neurons = 32, 5, 1
    F = Cout + nG

    key = jax.random.PRNGKey(0)
    ks = jax.random.split(key, 17)

    def u(k, shape, bound):
        return jax.random.uniform(k, shape, jnp.float32, -bound, bound)

    fan_conv = Cin * K
    params = {
        "conv_w": u(ks[0], (Cout, Cin, K), float(np.sqrt(6.0 / fan_conv))),
        "conv_b": u(ks[1], (Cout,), float(1.0 / np.sqrt(fan_conv))),
        "dense_w": u(ks[2], (dense_neurons, F), float(np.sqrt(6.0 / F))),
        "dense_b": u(ks[3], (dense_neurons,), float(1.0 / np.sqrt(F))),
        # bn_start (Cin), bn_cnn1 (Cout), bn_dense (F): nontrivial running stats.
        "bn0_g": jax.random.uniform(ks[4], (Cin,), jnp.float32, 0.5, 1.5),
        "bn0_b": 0.1 * jax.random.normal(ks[5], (Cin,), jnp.float32),
        "bn0_m": 0.1 * jax.random.normal(ks[6], (Cin,), jnp.float32),
        "bn0_v": jax.random.uniform(ks[7], (Cin,), jnp.float32, 0.5, 1.5),
        "bn1_g": jax.random.uniform(ks[8], (Cout,), jnp.float32, 0.5, 1.5),
        "bn1_b": 0.1 * jax.random.normal(ks[9], (Cout,), jnp.float32),
        "bn1_m": 0.1 * jax.random.normal(ks[10], (Cout,), jnp.float32),
        "bn1_v": jax.random.uniform(ks[11], (Cout,), jnp.float32, 0.5, 1.5),
        "bn2_g": jax.random.uniform(ks[12], (F,), jnp.float32, 0.5, 1.5),
        "bn2_b": 0.1 * jax.random.normal(ks[13], (F,), jnp.float32),
        "bn2_m": 0.1 * jax.random.normal(ks[14], (F,), jnp.float32),
        "bn2_v": jax.random.uniform(ks[15], (F,), jnp.float32, 0.5, 1.5),
    }

    # Input x: (B, n_local + n_global, L) -- matches the PyTorch NCL convention.
    x = jax.random.normal(ks[16], (B, Cin + nG, L), jnp.float32)

    ref = jax.block_until_ready(
        reference_forward(x, params, local_features, global_features))

    out = jax.block_until_ready(
        single_cnn_forward(x, params, local_features, global_features))
    assert out.shape == (B, dense_neurons), out.shape
    np.testing.assert_allclose(np.asarray(out), np.asarray(ref), rtol=1e-3, atol=1e-3)

    print("KERNEL_OK")
</pallas_src>

<mosaic_0001>
module attributes {stable_mosaic.version = 11 : i64} {
  func.func @single_cnn_kernel(%arg0: i32, %arg1: memref<2x7x16xf32, #tpu.memory_space<vmem>>, %arg2: memref<32x35xf32, #tpu.memory_space<vmem>>, %arg3: memref<32x16xf32, #tpu.memory_space<vmem>>, %arg4: memref<1x32xf32, #tpu.memory_space<vmem>>, %arg5: memref<1x1x2xf32, #tpu.memory_space<vmem>>, %arg6: memref<1x1x2xf32, #tpu.memory_space<vmem>>) attributes {dimension_semantics = [#tpu.dimension_semantics<parallel>], iteration_bounds = array<i64: 2>, scalar_prefetch = 0 : i64, scratch_operands = 0 : i64, tpu.core_type = #tpu.core_type<tc>, window_params = [{transform_indices = @transform_0, window_bounds = array<i64: 2, 7, 16>}, {pipeline_mode = #tpu.pipeline_mode<synchronous>, transform_indices = @transform_1, window_bounds = array<i64: 32, 35>}, {pipeline_mode = #tpu.pipeline_mode<synchronous>, transform_indices = @transform_2, window_bounds = array<i64: 32, 16>}, {pipeline_mode = #tpu.pipeline_mode<synchronous>, transform_indices = @transform_3, window_bounds = array<i64: 1, 32>}, {transform_indices = @transform_4, window_bounds = array<i64: 1, 1, 2>}, {transform_indices = @transform_5, window_bounds = array<i64: 1, 1, 2>}]} {
    %c0 = arith.constant 0 : index
    %c0_0 = arith.constant 0 : index
    %c0_1 = arith.constant 0 : index
    %0 = vector.load %arg1[%c0, %c0_0, %c0_1] : memref<2x7x16xf32, #tpu.memory_space<vmem>>, vector<2x7x16xf32>
    %cst = arith.constant 0.000000e+00 : f32
    %1 = vector.broadcast %cst : f32 to vector<2x7x2xf32>
    %2 = tpu.concatenate %1, %0, %1 in 2 : vector<2x7x2xf32>, vector<2x7x16xf32>, vector<2x7x2xf32> -> vector<2x7x20xf32>
    %3 = vector.extract_strided_slice %2 {offsets = [0, 0, 0], sizes = [2, 7, 16], strides = [1, 1, 1]} : vector<2x7x20xf32> to vector<2x7x16xf32>
    %4 = vector.extract_strided_slice %2 {offsets = [0, 0, 1], sizes = [2, 7, 16], strides = [1, 1, 1]} : vector<2x7x20xf32> to vector<2x7x16xf32>
    %5 = vector.extract_strided_slice %2 {offsets = [0, 0, 2], sizes = [2, 7, 16], strides = [1, 1, 1]} : vector<2x7x20xf32> to vector<2x7x16xf32>
    %6 = vector.extract_strided_slice %2 {offsets = [0, 0, 3], sizes = [2, 7, 16], strides = [1, 1, 1]} : vector<2x7x20xf32> to vector<2x7x16xf32>
    %7 = vector.extract_strided_slice %2 {offsets = [0, 0, 4], sizes = [2, 7, 16], strides = [1, 1, 1]} : vector<2x7x20xf32> to vector<2x7x16xf32>
    %8 = tpu.concatenate %3, %4, %5, %6, %7 in 1 : vector<2x7x16xf32>, vector<2x7x16xf32>, vector<2x7x16xf32>, vector<2x7x16xf32>, vector<2x7x16xf32> -> vector<2x35x16xf32>
    %c0_2 = arith.constant 0 : index
    %c0_3 = arith.constant 0 : index
    %9 = vector.load %arg2[%c0_2, %c0_3] : memref<32x35xf32, #tpu.memory_space<vmem>>, vector<32x35xf32>
    %10 = vector.shape_cast %9 : vector<32x35xf32> to vector<1x32x35xf32>
    %11 = vector.shape_cast %10 : vector<1x32x35xf32> to vector<1x32x35xf32>
    %12 = vector.broadcast %11 : vector<1x32x35xf32> to vector<2x32x35xf32>
    %cst_4 = arith.constant dense<0.000000e+00> : vector<2x32x16xf32>
    %13 = tpu.matmul %12, %8, %cst_4 {dimension_numbers = #tpu.dot_dimension_numbers<[2], [1], [1], [2], [0, 0, 0, 1, 1, 2], [0], [0]>} : vector<2x32x35xf32>, vector<2x35x16xf32>, vector<2x32x16xf32> -> vector<2x32x16xf32>
    %c0_5 = arith.constant 0 : index
    %c0_6 = arith.constant 0 : index
    %14 = vector.load %arg3[%c0_5, %c0_6] : memref<32x16xf32, #tpu.memory_space<vmem>>, vector<32x16xf32>
    %15 = vector.shape_cast %14 : vector<32x16xf32> to vector<1x32x16xf32>
    %16 = vector.broadcast %15 : vector<1x32x16xf32> to vector<2x32x16xf32>
    %17 = arith.addf %13, %16 : vector<2x32x16xf32>
    %cst_7 = arith.constant 0.000000e+00 : f32
    %18 = vector.broadcast %cst_7 : f32 to vector<2x32x16xf32>
    %19 = arith.maximumf %17, %18 : vector<2x32x16xf32>
    %cst_8 = arith.constant dense<0xFF800000> : vector<2x32xf32>
    %20 = vector.multi_reduction <maximumf>, %19, %cst_8 [2] : vector<2x32x16xf32> to vector<2x32xf32>
    %c0_9 = arith.constant 0 : index
    %c0_10 = arith.constant 0 : index
    %21 = vector.load %arg4[%c0_9, %c0_10] : memref<1x32xf32, #tpu.memory_space<vmem>>, vector<1x32xf32>
    %cst_11 = arith.constant dense<0.000000e+00> : vector<1x2xf32>
    %22 = tpu.matmul %21, %20, %cst_11 {dimension_numbers = #tpu.dot_dimension_numbers<[1], [1], [0], [0], [0, 0, 1, 0], [], []>} : vector<1x32xf32>, vector<2x32xf32>, vector<1x2xf32> -> vector<1x2xf32>
    %c0_12 = arith.constant 0 : index
    %c0_13 = arith.constant 0 : index
    %c0_14 = arith.constant 0 : index
    %23 = vector.load %arg5[%c0_12, %c0_13, %c0_14] : memref<1x1x2xf32, #tpu.memory_space<vmem>>, vector<1x1x2xf32>
    %24 = vector.shape_cast %23 : vector<1x1x2xf32> to vector<1x2xf32>
    %25 = arith.addf %22, %24 : vector<1x2xf32>
    %cst_15 = arith.constant 5.000000e-01 : f32
    %26 = vector.broadcast %cst_15 : f32 to vector<1x2xf32>
    %27 = arith.mulf %26, %25 : vector<1x2xf32>
    %28 = math.tanh %27 : vector<1x2xf32>
    %cst_16 = arith.constant 1.000000e+00 : f32
    %29 = vector.broadcast %cst_16 : f32 to vector<1x2xf32>
    %30 = arith.addf %28, %29 : vector<1x2xf32>
    %cst_17 = arith.constant 5.000000e-01 : f32
    %31 = vector.broadcast %cst_17 : f32 to vector<1x2xf32>
    %32 = arith.mulf %31, %30 : vector<1x2xf32>
    %c0_18 = arith.constant 0 : index
    %c0_19 = arith.constant 0 : index
    %c0_20 = arith.constant 0 : index
    %33 = vector.load %arg6[%c0_18, %c0_19, %c0_20] : memref<1x1x2xf32, #tpu.memory_space<vmem>>, vector<1x1x2xf32>
    %34 = vector.shape_cast %33 : vector<1x1x2xf32> to vector<1x2xf32>
    %35 = vector.shape_cast %32 : vector<1x2xf32> to vector<1x1x2xf32>
    tpu.vector_store %arg6[%c0_18, %c0_19, %c0_20], %35 {strides = array<i32>} : memref<1x1x2xf32, #tpu.memory_space<vmem>>, vector<1x1x2xf32>,
    return
  }
  func.func @transform_0(%arg0: i32) -> (i32, i32, i32) {
    %c0_i32 = arith.constant 0 : i32
    %c0_i32_0 = arith.constant 0 : i32
    %c0_i32_1 = arith.constant 0 : i32
    return %arg0, %c0_i32, %c0_i32_0 : i32, i32, i32
  }
  func.func @transform_1(%arg0: i32) -> (i32, i32) {
    %c0_i32 = arith.constant 0 : i32
    %c0_i32_0 = arith.constant 0 : i32
    %c0_i32_1 = arith.constant 0 : i32
    return %c0_i32, %c0_i32_0 : i32, i32
  }
  func.func @transform_2(%arg0: i32) -> (i32, i32) {
    %c0_i32 = arith.constant 0 : i32
    %c0_i32_0 = arith.constant 0 : i32
    %c0_i32_1 = arith.constant 0 : i32
    return %c0_i32, %c0_i32_0 : i32, i32
  }
  func.func @transform_3(%arg0: i32) -> (i32, i32) {
    %c0_i32 = arith.constant 0 : i32
    %c0_i32_0 = arith.constant 0 : i32
    %c0_i32_1 = arith.constant 0 : i32
    return %c0_i32, %c0_i32_0 : i32, i32
  }
  func.func @transform_4(%arg0: i32) -> (i32, i32, i32) {
    %c0_i32 = arith.constant 0 : i32
    %c0_i32_0 = arith.constant 0 : i32
    %c0_i32_1 = arith.constant 0 : i32
    return %arg0, %c0_i32, %c0_i32_0 : i32, i32, i32
  }
  func.func @transform_5(%arg0: i32) -> (i32, i32, i32) {
    %c0_i32 = arith.constant 0 : i32
    %c0_i32_0 = arith.constant 0 : i32
    %c0_i32_1 = arith.constant 0 : i32
    return %arg0, %c0_i32, %c0_i32_0 : i32, i32, i32
  }
}

</mosaic_0001>

<bundles_post_ra>
// kernel: tpu_custom_call.1
= control target key start
LH: loop header
LB: loop body
LE: loop exit
PB: predicated region body
PF: predicated region fallthrough
CT: control target
= control target key end

     0   :  { %10 = vsyncpa [#allocation3], 0  ;;  %s877_s0 = inlined_call_operand.vmem [shape: f32[4,7,16], index: 0, kind: input, shape index: {}]   ;;  %s878_s1 = inlined_call_operand.vmem [shape: f32[32,35], index: 1, kind: input, shape index: {}]   ;;  %s879_s2 = inlined_call_operand.vmem [shape: f32[32,16], index: 2, kind: input, shape index: {}]   ;;  %s880_s3 = inlined_call_operand.vmem [shape: f32[1,32], index: 3, kind: input, shape index: {}]   ;;  %s881_s4 = inlined_call_operand.vmem [shape: f32[2,1,2], index: 4, kind: input, shape index: {}]   ;;  %s882_s5 = inlined_call_operand.hbm [shape: f32[2,1,2], index: 5, kind: output, shape index: {}]  }
   0x1   :  { %12 = vsyncpa [#allocation3 + $0x1], 0  ;;  %s745_s18 = smov 0   ;;  %s747_s19 = smov 0  }
   0x2   :  { %s749_s20 = smov 0   ;;  %s751_s21 = smov 0  }
   0x3 LB: > { %s766_s22 = sadd.s32 4294967295, %s708_s21   ;;  %s560_s23 = sadd.s32 4294967294, %s708_s21   ;;  %s708_s21 = sphi %s751_s21, %s888_s21   ;;  %s704_s20 = sphi %s749_s20, %s887_s20   ;;  %s700_s19 = sphi %s747_s19, %s886_s19   ;;  %s696_s18 = sphi %s745_s18, %s885_s18  }
   0x4   : > { %s770_s24 = sadd.s32 1, %s708_s21   ;;  %s140_s25 = sadd.s32 1, %s704_s20 }
   0x5   : > { %s137_s26 = ssub.s32 %s708_s21, %s770_s24  ;;  %p150_p0 = scmp.ne.s32.totalorder %s704_s20, %s700_s19 }
   0x6   : > { %p138_p1 = scmp.eq.s32.totalorder %s137_s26, 0  ;;  %p151_p2 = scmp.eq.s32.totalorder %s766_s22, 1 }
   0x7   : > { %p156_p3 = scmp.ne.s32.totalorder %s700_s19, %s696_s18  ;;  %p157_p4 = scmp.eq.s32.totalorder %s560_s23, 1 }
   0x8   : > { %s781_s27 = scalar_select %p138_p1, %s704_s20, %s140_s25  }
   0x9   : > { %p783_p5 = por %p151_p2, %p150_p0  ;;  %p787_p6 = por %p157_p4, %p156_p3 }
   0xa   : > { %p563_p7 = scmp.ge.s32.totalorder %s708_s21, 1  ;;  %p199_p8 = scmp.lt.s32.totalorder %s708_s21, 3 }
   0xc   : > { %p200_p9 = pnand %p563_p7, %p199_p8 }
   0xd   : > { %s564_s30 = sshll.u32 (!%p200_p9), %s766_s22, 1  ;;  %s710_s10 = smov (!%p200_p9), 2  }
   0xe   : > { %203 = sbr.rel (%p200_p9) target bundleno = 707 (0x2c3), region = 40  ;;  %p230_p10 = scmp.lt.s32.totalorder (!%p200_p9), %s564_s30, 3 }
   0xf   : > { %s711_s11 = smov (!%p200_p9), 124   ;;  %s712_s12 = smov (!%p200_p9), 127  }
  0x10   : > { %s713_s13 = smov (!%p200_p9), 125   ;;  %s714_s14 = smov (!%p200_p9), 126  }
  0x11   : > { %p235_p11 = scmp.lt.s32.totalorder (!%p200_p9), %s766_s22, 1  ;;  %s492_s8 = scalar_lea.hbm (!%p200_p9), %s882_s5, %s766_s22 }
  0x12   : > { %s666_s16 = scalar_lea.hbm (!%p200_p9), %s882_s5, 2 }
  0x13   : > { %s890_s30 = smov (!%p230_p10, %s564_s30), 3  ;;  %vm248_vm0 = vcmask 15360   ;;  %vm251_vm1 = vcmask 146432   ;;  %vm321_vm2 = vcmask 1042432   ;;  %vm297_vm3 = vcmask 1043456   ;;  %v300_v35 = vld [vmem:[%s878_s1] sm:$0xff] }
  0x14   : > { %s565_s6 = sshll.u32 %s890_s30, 3  ;;  %vm294_vm4 = vcmask 1044480   ;;  %vm291_vm5 = vcmask 1045504   ;;  %vm288_vm6 = vcmask 1046528   ;;  %vm308_vm7 = vcmask 285696   ;;  %v302_v36 = vld [vmem:[%s878_s1 + $0x10] sm:$0xff] }
  0x15   : > { %s233_s9 = scalar_lea.vmem %s877_s0, %s565_s6  ;;  %v303_v38 = vld [vmem:[%s878_s1 + $0x18] sm:$0xff]  ;;  %v301_v39 = vld [vmem:[%s878_s1 + $0x8] sm:$0xff]  ;;  %v304_v40 = vld [vmem:[%s879_s2] sm:$0xff]  ;;  %vm392_vm8 = vcmask 130048   ;;  %vm432_vm9 = vcmask 130112   ;;  %vm436_vm10 = vcmask 195712  }
  0x16   : > { %v239_v0 = vld [vmem:[%s233_s9 + $0x8] sm:$0x7f]  ;;  %v238_v1 = vld [vmem:[%s233_s9] sm:$0x7f]  ;;  %v306_v47 = vld [vmem:[%s879_s2 + $0x10] sm:$0xff]  ;;  %vm440_vm11 = vcmask 261312  }
  0x17   : > { %244 = vrot.lane.b32.xlu0 %v239_v0, %s710_s10  ;;  %v305_v50 = vld [vmem:[%s879_s2 + $0x8] sm:$0xff]  ;;  %v307_v60 = vld [vmem:[%s879_s2 + $0x18] sm:$0xff]  ;;  %vm449_vm12 = vcmask 1041409   ;;  %vm451_vm13 = vcmask 261120   ;;  %s236_s17 = scalar_select %p235_p11, %s766_s22, 1  ;;  %vm481_vm14 = vcmask 8192  }
  0x18   : > { %s227_s30 = sand.u32 1, %s700_s19  }
  0x19   : > { %s237_s26 = scalar_lea.vmem %s881_s4, %s236_s17  ;;  %s228_s9 = scalar_lea.vmem [#allocation2], %s227_s30 }
  0x1f   : > { %242 = vrot.lane.b32.xlu0 %v238_v1, %s710_s10  ;;  %s494_s10 = sshll.u32 %s228_s9, 4  ;;  %s495_s10 = int_to_ptr.vmem [resolvable:$true] %s494_s10 }
  0x89   : > { %v245_v2 = vpop.permute.xlu0 %244 }
  0x8a   : > { %v250_v3 = vsel %vm248_vm0, 0.0, %v245_v2 }
  0x8b   : > { %v253_v4 = vsel %vm251_vm1, %v250_v3, 0.0 }
  0x8c   : > { %v281_v5 = vrot.slane %v253_v4, 4  ;;  %v257_v6 = vrot.slane %v253_v4, 1  ;;  %v273_v11 = vrot.slane %v253_v4, 3  ;;  %v265_v13 = vrot.slane %v253_v4, 2 }
  0x8e   : > { %284 = vrot.lane.b32.xlu1 %v281_v5, %s711_s11  ;;  %260 = vrot.lane.b32.xlu0 %v257_v6, %s712_s12 }
  0x91   : > { %v243_v7 = vpop.permute.xlu0 %242 }
  0x92   : > { %v249_v8 = vsel %vm248_vm0, 0.0, %v243_v7 }
  0x93   : > { %v252_v9 = vsel %vm251_vm1, %v249_v8, 0.0 }
  0x94   : > { %v272_v10 = vrot.slane %v252_v9, 3  ;;  %v264_v12 = vrot.slane %v252_v9, 2  ;;  %v280_v16 = vrot.slane %v252_v9, 4  ;;  %v256_v17 = vrot.slane %v252_v9, 1 }
  0x96   : > { %v634_v14 = vpack.i.bf16 %v272_v10, %v273_v11  ;;  %v639_v15 = vpack.i.bf16 %v264_v12, %v265_v13 }
  0x98   : > { %635 = vrot.lane.b32.xlu1 %v634_v14, %s713_s13  ;;  %640 = vrot.lane.b32.xlu2 %v639_v15, %s714_s14  ;;  %v427_v14 = vlaneseq }
  0xa0   : > { %282 = vrot.lane.b32.xlu2 %v280_v16, %s711_s11  ;;  %258 = vrot.lane.b32.xlu1 %v256_v17, %s712_s12  ;;  %v428_v17 = vand.u32 127, %v427_v14  ;;  %s496_s11 = sshll.u32 %s492_s8, 4  ;;  %s484_s12 = scalar_lea.sflag [#allocation3], %s227_s30  ;;  %s497_s11 = int_to_ptr.hbm [resolvable:$true] %s496_s11 }
  0xa1   : > { %s660_s13 = sshra.s32 %s497_s11, 4  ;;  %s661_s13 = int_to_ptr.hbm [resolvable:$true] %s660_s13 }
  0xa2   : > { %s662_s14 = scalar_lea.hbm %s661_s13, 1  ;;  %p667_p1 = scmp.lt.s32.totalorder %s661_s13, %s882_s5 }
  0xa3   : > { %p663_p12 = scmp.ne.s32.totalorder %s661_s13, %s662_s14  ;;  %p668_p2 = scmp.lt.s32.totalorder %s666_s16, %s662_s14 }
  0xa5   : > { %p664_p13 = pnand %p663_p12, %p783_p5  ;;  %p669_p3 = por %p668_p2, %p667_p1 }
  0xa7   : > { %p665_p0 = pneg %p664_p13 }
  0xa9   : > { %p670_p4 = pnand %p669_p3, %p665_p0 }
  0xf2   : > { %v641_v18 = vpop.permute.xlu2 %640 }
  0xf3   : > { %v643_v24 = vunpack.i.h.bf16 %v641_v18  ;;  %v642_v27 = vunpack.i.l.bf16 %v641_v18  ;;  %v430_v18 = vadd.s32 4294967288, %v428_v17 }
  0xfa   : > { %v283_v19 = vpop.permute.xlu2 %282 }
  0xfb   : > { %566 = vmatpush.msk.msra.mxu0 %vm321_vm2, %v283_v19  ;;  %580 = vmatpush.msk.msra.mxu3 %vm321_vm2, %v283_v19 }
 0x100   : > { %v285_v20 = vpop.permute.xlu1 %284  ;;  %v261_v28 = vpop.permute.xlu0 %260 }
 0x101   : > { %571 = vmatpush.msk.msra.mxu1 %vm321_vm2, %v285_v20  ;;  %585 = vmatpush.msk.msra.mxu2 %vm321_vm2, %v285_v20  ;;  %v293_v32 = vsel %vm291_vm5, %v261_v28, %v642_v27  ;;  %v290_v34 = vsel %vm288_vm6, %v253_v4, %v261_v28 }
 0x10a   : > { %v636_v21 = vpop.permute.xlu1 %635 }
 0x10b   : > { %v638_v22 = vunpack.i.h.bf16 %v636_v21  ;;  %v637_v23 = vunpack.i.l.bf16 %v636_v21 }
 0x10d   : > { %v298_v25 = vsel %vm297_vm3, %v638_v22, %v283_v19  ;;  %v299_v26 = vsel %vm297_vm3, %v637_v23, %v285_v20  ;;  %v295_v29 = vsel %vm294_vm4, %v643_v24, %v638_v22  ;;  %v296_v30 = vsel %vm294_vm4, %v642_v27, %v637_v23 }
 0x10e   : > { %336 = vmatpush.msra.mxu0 %v298_v25  ;;  %581 = vmatpush.msra.mxu3 %v298_v25  ;;  %v434_v20 = vadd.s32 4294967280, %v428_v17  ;;  %v438_v22 = vadd.s32 4294967272, %v428_v17 }
 0x10f   : > { %367 = vmatpush.msra.mxu1 %v299_v26  ;;  %586 = vmatpush.msra.mxu2 %v299_v26 }
 0x110   : > { %337 = vmatpush.msra.mxu0 %v295_v29  ;;  %582 = vmatpush.msra.mxu3 %v295_v29 }
 0x111   : > { %368 = vmatpush.msra.mxu1 %v296_v30  ;;  %587 = vmatpush.msra.mxu2 %v296_v30 }
 0x112   : > { %v259_v31 = vpop.permute.xlu1 %258 }
 0x113   : > { %369 = vmatpush.msra.mxu1 %v293_v32  ;;  %588 = vmatpush.msra.mxu2 %v293_v32  ;;  %v292_v33 = vsel %vm291_vm5, %v259_v31, %v643_v24  ;;  %v289_v37 = vsel %vm288_vm6, %v252_v9, %v259_v31 }
 0x114   : > { %338 = vmatpush.msra.mxu0 %v292_v33  ;;  %583 = vmatpush.msra.mxu3 %v292_v33 }
 0x115   : > { %370 = vmatpush.msra.mxu1 %v290_v34  ;;  %589 = vmatpush.msra.mxu2 %v290_v34 }
 0x116   : > { %339 = vmatpush.msra.mxu0 %v289_v37  ;;  %584 = vmatpush.msra.mxu3 %v289_v37 }
 0x117   : > { %567 = vmatmul.msk.f32.vlgmr.msra.gmra.mxu0 %vm308_vm7, %v300_v35  ;;  %569 = vmatmul.msk.f32.vlgmr.msra.gmra.mxu3 %vm308_vm7, %v302_v36 }
 0x118   : > { %572 = vmatmul.msk.f32.vlgmr.msra.gmra.mxu1 %vm308_vm7, %v300_v35  ;;  %575 = vmatmul.msk.f32.vlgmr.msra.gmra.mxu2 %vm308_vm7, %v303_v38 }
 0x11f   : > { %568 = vmatmul.msk.f32.gmra.mxu0 %vm308_vm7, %v301_v39  ;;  %570 = vmatmul.msk.f32.gmra.mxu3 %vm308_vm7, %v303_v38 }
 0x120   : > { %573 = vmatmul.msk.f32.gmra.mxu1 %vm308_vm7, %v301_v39 }
 0x128   : > { %574 = vmatmul.msk.f32.gmra.mxu1 %vm308_vm7, %v302_v36 }
 0x194   : > { %v341_v41 = vpop.f32.mrf.mxu0 }
 0x195   : > { %v342_v42 = vadd.f32 %v341_v41, %v304_v40  ;;  %v372_v43 = vpop.f32.mrf.mxu1  ;;  %v418_v41 = vld [vmem:[%s237_s26] sm:$0x1] }
 0x196   : > { %v373_v44 = vadd.f32 %v372_v43, %v304_v40  ;;  %v417_v40 = vld [vmem:[%s880_s3] sm:$0x1] }
 0x197   : > { %v384_v45 = vmax.f32 %v342_v42, 0.0 }
 0x198   : > { %v388_v46 = vmax.f32 %v373_v44, 0.0 }
 0x199   : > { %v393_v48 = vsel %vm392_vm8, %v384_v45, -inf }
 0x19a   : > { %v347_v49 = vpop.f32.mrf.mxu3  ;;  %394 = vmax.xlane.f32.xlu2 %v393_v48  ;;  %v405_v51 = vsel %vm392_vm8, %v388_v46, -inf }
 0x19b   : > { %v348_v52 = vadd.f32 %v347_v49, %v306_v47  ;;  %406 = vmax.xlane.f32.xlu1 %v405_v51  ;;  %v381_v1 = vpop.f32.mrf.mxu2 }
 0x19c   : > { %v344_v53 = vpop.f32.mrf.mxu0  ;;  %v382_v7 = vadd.f32 %v381_v1, %v307_v60 }
 0x19d   : > { %v386_v54 = vmax.f32 %v348_v52, 0.0  ;;  %v345_v55 = vadd.f32 %v344_v53, %v305_v50  ;;  %v375_v56 = vpop.f32.mrf.mxu1 }
 0x19e   : > { %v376_v58 = vadd.f32 %v375_v56, %v305_v50  ;;  %v391_v10 = vmax.f32 %v382_v7, 0.0 }
 0x19f   : > { %v385_v57 = vmax.f32 %v345_v55, 0.0  ;;  %v399_v59 = vsel %vm392_vm8, %v386_v54, -inf }
 0x1a0   : > { %v389_v63 = vmax.f32 %v376_v58, 0.0  ;;  %v414_v11 = vsel %vm392_vm8, %v391_v10, -inf }
 0x1a1   : > { %v396_v61 = vsel %vm392_vm8, %v385_v57, -inf }
 0x1a2   : > { %v350_v62 = vpop.f32.mrf.mxu3  ;;  %397 = vmax.xlane.f32.xlu0 %v396_v61  ;;  %400 = vmax.xlane.f32.xlu2 %v399_v59  ;;  %v408_v6 = vsel %vm392_vm8, %v389_v63, -inf }
 0x1a3   : > { %v351_v0 = vadd.f32 %v350_v62, %v307_v60 }
 0x1a5   : > { %v387_v2 = vmax.f32 %v351_v0, 0.0  ;;  %v378_v3 = vpop.f32.mrf.mxu1 }
 0x1a6   : > { %v379_v4 = vadd.f32 %v378_v3, %v306_v47 }
 0x1a7   : > { %v402_v5 = vsel %vm392_vm8, %v387_v2, -inf }
 0x1a8   : > { %v390_v8 = vmax.f32 %v379_v4, 0.0  ;;  %403 = vmax.xlane.f32.xlu1 %v402_v5 }
 0x1aa   : > { %409 = vmax.xlane.f32.xlu2 %v408_v6  ;;  %v411_v9 = vsel %vm392_vm8, %v390_v8, -inf }
 0x1ab   : > { %412 = vmax.xlane.f32.xlu0 %v411_v9 }
 0x1b2   : > { %415 = vmax.xlane.f32.xlu2 %v414_v11 }
 0x20d   : > { %v395_v12 = vpop.xlane.xlu2 %394 }
 0x20e   : > { %v407_v16 = vpop.xlane.xlu1 %406  ;;  %v429_v26 = vperm.slane %v395_v12, %v428_v17 }
 0x20f   : > { %v442_v27 = vperm.slane %v407_v16, %v428_v17 }
 0x215   : > { %v401_v13 = vpop.xlane.xlu2 %400  ;;  %v398_v15 = vpop.xlane.xlu0 %397 }
 0x216   : > { %v431_v21 = vperm.slane %v398_v15, %v430_v18  ;;  %v435_v28 = vperm.slane %v401_v13, %v434_v20 }
 0x218   : > { %v433_v30 = vsel %vm432_vm9, %v431_v21, %v429_v26 }
 0x219   : > { %v437_v36 = vsel %vm436_vm10, %v435_v28, %v433_v30 }
 0x21b   : > { %v404_v25 = vpop.xlane.xlu1 %403 }
 0x21c   : > { %v439_v31 = vperm.slane %v404_v25, %v438_v22 }
 0x21d   : > { %v410_v19 = vpop.xlane.xlu2 %409 }
 0x21e   : > { %v443_v23 = vperm.slane %v410_v19, %v430_v18  ;;  %v413_v24 = vpop.xlane.xlu0 %412  ;;  %v441_v37 = vsel %vm440_vm11, %v439_v31, %v437_v36 }
 0x21f   : > { %v445_v29 = vperm.slane %v413_v24, %v434_v20 }
 0x220   : > { %v444_v32 = vsel %vm432_vm9, %v443_v23, %v442_v27 }
 0x221   : > { %v446_v35 = vsel %vm436_vm10, %v445_v29, %v444_v32 }
 0x225   : > { %v416_v33 = vpop.xlane.xlu2 %415 }
 0x226   : > { %v447_v34 = vperm.slane %v416_v33, %v438_v22 }
 0x228   : > { %v448_v38 = vsel %vm440_vm11, %v447_v34, %v446_v35 }
 0x229   : > { %v450_v39 = vsel %vm449_vm12, %v448_v38, %v441_v37 }
 0x22a   : > { %576 = vmatpush.xpose.msk.msrb.mxu2 %vm451_vm13, %v450_v39 }
 0x22d   : > { %577 = vmatmul.msk.f32.vlgmr.msrb.gmra.mxu2 %vm451_vm13, %v417_v40 }
 0x2b0   : > { %v474_v42 = vpop.f32.mrf.mxu2 }
 0x2b1   : > { %v475_v43 = vadd.f32 %v474_v42, %v418_v41 }
 0x2b3   : > { %v477_v44 = vmul.f32 0.5, %v475_v43 }
 0x2b5   : > { %644 = vtanh.f32 %v477_v44 }
 0x2bb   : > { %v645_v45 = vpop.eup %644 }
 0x2bc   : > { %v479_v46 = vadd.f32 1.0, %v645_v45 }
 0x2be   : > { %v480_v47 = vmul.f32 0.5, %v479_v46 }
 0x2c0   : > { %482 = vst.msk [vmem:[%s228_s9] sm:$0x1] %vm481_vm14, %v480_v47 }
 0x2c1   : > { %673 = shalt.err (!%p670_p4)
}
 0x2c2   : > { %590 = dma.vmem_to_hbm [thread:$0]  (%p783_p5), %s495_s10, 16, %s497_s11, %s484_s12  }
 0x2c3 PF: > { %p596_p7 = scmp.ge.s32.totalorder %s708_s21, 2  ;;  %s508_s25 = sand.u32 1, %s696_s18  }
 0x2c4   : > { %s509_s26 = scalar_lea.sflag [#allocation3], %s508_s25 }
 0x2c5   : > { %p593_p8 = pnand %p596_p7, %p787_p6 }
 0x2c7   : > { %p594_p9 = pneg %p593_p8 }
 0x2c9   : > { %691 = dma.done.wait (%p594_p9), %s509_s26, 16  }
 0x2ca   : > { %693 = vsyncadd (%p594_p9), %s509_s26, 4294967280  ;;  %p15_p10 = scmp.ge.s32.totalorder %s770_s24, 4   ;;  %s885_s18 = smov %s700_s19 }
 0x2cb   : > { %s886_s19 = smov %s704_s20  ;;  %s887_s20 = smov %s781_s27 }
 0x2cc   : > { %s888_s21 = smov %s770_s24  ;;  %17 = sbr.rel (!%p15_p10) target bundleno = 3 (0x3), region = 78 }
 0x2d1   :  { %514 = vsyncpa [#allocation3], 1 }
 0x2d2   :  { %516 = vsyncpa [#allocation3 + $0x1], 1 }

</bundles_post_ra>
